<compile_context>
chip_gen: v5e
topology: v5e:2x2
jax: 0.10.0
libtpu: 0.0.40
codegen_flags: <defaults>
</compile_context>

<pallas_src>
import jax
import jax.numpy as jnp
from jax.experimental import pallas as pl
from jax.experimental.pallas import tpu as pltpu


# ----------------------------- Pallas kernel ------------------------------ #
def _kvlora_kernel(k_ref, v_ref, ka_ref, kb_ref, va_ref, vb_ref, ko_ref, vo_ref):
    # k_ref / v_ref / ko_ref / vo_ref : (bsz, tg_tile, g*D)   -- one head, one token-group tile
    # ka_ref / va_ref                 : (tg_tile, g*rank)     -- grouped lora_A slice
    # kb_ref / vb_ref                 : (g*rank, g*D)         -- block-diagonal lora_B
    # delta comes out of the MXU already in the fused lane-dense layout.
    kd = jnp.dot(ka_ref[...], kb_ref[...], preferred_element_type=jnp.float32)
    vd = jnp.dot(va_ref[...], vb_ref[...], preferred_element_type=jnp.float32)
    # Single cast of the (tiny) delta to the KV dtype; add & store in KV dtype.
    ko_ref[...] = k_ref[...] + kd.astype(ko_ref.dtype)[None]
    vo_ref[...] = v_ref[...] + vd.astype(vo_ref.dtype)[None]


# ------------------------------ tiling helpers ----------------------------- #
def _choose_group(T, D):
    """Smallest token-group size g >= ceil(128/D) dividing T (1 if D >= 128)."""
    if D >= 128:
        return 1
    g0 = -(-128 // D)
    for g in range(g0, T + 1):
        if T % g == 0:
            return g
    return 1  # fallback: correct, but stores are masked (D < 128, no divisor)


def _choose_group_tile(Tg, row_bytes, target_block_bytes=4 * 1024 * 1024):
    """Largest legal token-group tile whose KV block fits the byte target.

    Legal tiles: the full extent Tg, or any multiple-of-8 divisor of Tg
    (sublane rule on the (bsz, tg_tile, g*D) block). If nothing fits the
    target, return the smallest legal tile (bounds VMEM instead of blowing it).
    """
    legal = [Tg] + [t for t in range(8, Tg, 8) if Tg % t == 0]
    fitting = [t for t in legal if t * row_bytes <= target_block_bytes]
    if fitting:
        return max(fitting)
    return min(legal)


def _group_weights(A, B, g):
    """A: (HA, T, rank) -> (HA, T/g, g*rank); B: (H, rank, D) -> block-diag (H, g*rank, g*D)."""
    HA, T, rank = A.shape
    H, _, D = B.shape
    Tg = T // g
    A_g = A.reshape(HA, Tg, g * rank)
    eye = jnp.eye(g, dtype=B.dtype)
    B_g = jnp.einsum("jk,hrd->hjrkd", eye, B).reshape(H, g * rank, g * D)
    return A_g, B_g


# --------------------------- fused per-layer update ------------------------ #
def kvlora_update_layer(key, val, kA, kB, vA, vB,
                        target_block_bytes=4 * 1024 * 1024,
                        vmem_limit_bytes=48 * 1024 * 1024):
    """LoRA update of one layer's (key, value), fused into a single pallas_call.

    key, val : (bsz, H, T, D)
    kA, vA   : (HA, T, rank)   HA == 1 when heads share lora_A
    kB, vB   : (H, rank, D)
    """
    bsz, H, T, D = key.shape
    rank = kB.shape[1]

    g = _choose_group(T, D)
    Tg, gD, grank = T // g, g * D, g * rank

    kA_g, kB_g = _group_weights(kA, kB, g)
    vA_g, vB_g = _group_weights(vA, vB, g)

    # Free, contiguous reshape to a lane-dense last axis (g*D >= 128 when D < 128).
    key_f = key.reshape(bsz, H, Tg, gD)
    val_f = val.reshape(bsz, H, Tg, gD)

    tg_tile = _choose_group_tile(Tg, bsz * gD * key.dtype.itemsize, target_block_bytes)
    n_tg = Tg // tg_tile

    kv_spec = pl.BlockSpec((bsz, None, tg_tile, gD), lambda t, h: (0, h, t, 0))
    b_spec = pl.BlockSpec((None, grank, gD), lambda t, h: (h, 0, 0))

    def a_spec_for(Ag):
        if Ag.shape[0] == 1:   # shared lora_A: single copy in HBM, ignore head index
            return pl.BlockSpec((None, tg_tile, grank), lambda t, h: (0, t, 0))
        return pl.BlockSpec((None, tg_tile, grank), lambda t, h: (h, t, 0))

    kv_bytes = key.size * key.dtype.itemsize
    cost = pl.CostEstimate(
        flops=int(4 * H * T * D * grank + 4 * bsz * H * T * D),
        transcendentals=0,
        bytes_accessed=int(4 * kv_bytes),   # read+write of both K and V
    )

    k_new, v_new = pl.pallas_call(
        _kvlora_kernel,
        out_shape=(jax.ShapeDtypeStruct(key_f.shape, key.dtype),
                   jax.ShapeDtypeStruct(val_f.shape, val.dtype)),
        grid_spec=pltpu.PrefetchScalarGridSpec(
            num_scalar_prefetch=0,
            grid=(n_tg, H),               # token axis first: megacore shards tokens on v7x
            in_specs=[kv_spec, kv_spec,
                      a_spec_for(kA_g), b_spec,
                      a_spec_for(vA_g), b_spec],
            out_specs=(kv_spec, kv_spec),
        ),
        input_output_aliases={0: 0, 1: 1},   # key/value aliased in-place
        compiler_params=pltpu.CompilerParams(
            dimension_semantics=("parallel", "parallel"),
            vmem_limit_bytes=vmem_limit_bytes,
        ),
        cost_estimate=cost,
    )(key_f, val_f, kA_g, kB_g, vA_g, vB_g)

    return k_new.reshape(bsz, H, T, D), v_new.reshape(bsz, H, T, D)


# ------------------------------ glue / wrapper ----------------------------- #
def _canonical_weights(A_list, B_list, share_head, H, D):
    """Per-layer lists: A -> (HA, T, rank) (HA=1 if shared), B -> (H, rank, D)."""
    As, Bs = [], []
    for l in range(len(A_list)):
        if share_head:
            A = jnp.asarray(A_list[l])                        # (rank, T)
            Bw = jnp.asarray(B_list[l])                       # (H*D, rank)
            rank = A.shape[0]
            A_l = jnp.swapaxes(A, 0, 1)[None]                 # (1, T, rank) -- not broadcast to H
            B_l = jnp.swapaxes(Bw.reshape(H, D, rank), 1, 2)  # (H, rank, D)
        else:
            A_l = jnp.swapaxes(jnp.stack(A_list[l]), 1, 2)    # (H, T, rank)
            B_l = jnp.swapaxes(jnp.stack(B_list[l]), 1, 2)    # (H, rank, D)
        As.append(A_l)
        Bs.append(B_l)
    return As, Bs


def kvlora_forward(past_key_values, key_A, key_B, val_A, val_B, share_head):
    """Mirrors KVLora.forward. past_key_values: tuple over layers of
    (key, value), each (batch, num_head, num_token, token_dim)."""
    bsz, H, T, D = past_key_values[0][0].shape
    kA, kB = _canonical_weights(key_A, key_B, share_head, H, D)
    vA, vB = _canonical_weights(val_A, val_B, share_head, H, D)
    updated = []
    for l, (key, val) in enumerate(past_key_values):
        k_new, v_new = kvlora_update_layer(key, val, kA[l], kB[l], vA[l], vB[l])
        updated.append((k_new, v_new))
    return tuple(updated)


# ------------------------- pure-JAX reference (torch semantics) ------------ #
def kvlora_reference(past_key_values, key_A, key_B, val_A, val_B, share_head, H, D):
    updated = []
    for l, (key, val) in enumerate(past_key_values):
        layer_out = []
        for x, (As, Bs) in zip([key, val], [(key_A, key_B), (val_A, val_B)]):
            if share_head:
                delta_flat = Bs[l] @ As[l]                                   # (H*D, T)
                delta = delta_flat.reshape(H, D, -1).transpose(0, 2, 1)      # (H, T, D)
            else:
                delta = jnp.stack([(Bs[l][h] @ As[l][h]).T for h in range(H)])
            layer_out.append(x + delta[None])
        updated.append(tuple(layer_out))
    return tuple(updated)


# ----------------------------------- main ---------------------------------- #
if __name__ == "__main__":
    num_layer, num_head, num_token, token_dim, rank, batch = 2, 4, 8, 32, 4, 2

    root = jax.random.PRNGKey(0)
    ok = True
    for cfg_idx, share_head in enumerate((True, False)):
        ks = iter(jax.random.split(jax.random.fold_in(root, cfg_idx), 256))

        def rnd(shape, scale=0.05):
            return (scale * jax.random.normal(next(ks), shape)).astype(jnp.float32)

        # Fresh KV per config: the kernel aliases its KV inputs to the outputs,
        # so inputs must not be reused after the kernel call.
        past_kv = tuple(
            (rnd((batch, num_head, num_token, token_dim), 1.0),
             rnd((batch, num_head, num_token, token_dim), 1.0))
            for _ in range(num_layer)
        )

        # NOTE: the PyTorch module zero-inits lora_B (delta == 0 at init); random
        # values here exercise the kernel non-trivially.
        if share_head:
            key_A = [rnd((rank, num_token)) for _ in range(num_layer)]
            key_B = [rnd((num_head * token_dim, rank)) for _ in range(num_layer)]
            val_A = [rnd((rank, num_token)) for _ in range(num_layer)]
            val_B = [rnd((num_head * token_dim, rank)) for _ in range(num_layer)]
        else:
            key_A = [[rnd((rank, num_token)) for _ in range(num_head)] for _ in range(num_layer)]
            key_B = [[rnd((token_dim, rank)) for _ in range(num_head)] for _ in range(num_layer)]
            val_A = [[rnd((rank, num_token)) for _ in range(num_head)] for _ in range(num_layer)]
            val_B = [[rnd((token_dim, rank)) for _ in range(num_head)] for _ in range(num_layer)]

        # Compute the reference BEFORE the kernel (kernel may donate the KV buffers).
        ref = kvlora_reference(past_kv, key_A, key_B, val_A, val_B, share_head,
                               num_head, token_dim)
        ref = jax.block_until_ready(ref)

        out = kvlora_forward(past_kv, key_A, key_B, val_A, val_B, share_head)
        out = jax.block_until_ready(out)

        for (k_o, v_o), (k_r, v_r) in zip(out, ref):
            if not (jnp.allclose(k_o, k_r, atol=1e-5) and jnp.allclose(v_o, v_r, atol=1e-5)):
                ok = False

    if ok:
        print("KERNEL_OK")
    else:
        raise SystemExit("mismatch vs reference")
</pallas_src>

<mosaic_0001>
module attributes {stable_mosaic.version = 11 : i64} {
  func.func @_kvlora_kernel(%arg0: i32, %arg1: i32, %arg2: memref<2x1x2x128xf32, #tpu.memory_space<vmem>>, %arg3: memref<2x1x2x128xf32, #tpu.memory_space<vmem>>, %arg4: memref<1x2x16xf32, #tpu.memory_space<vmem>>, %arg5: memref<1x16x128xf32, #tpu.memory_space<vmem>>, %arg6: memref<1x2x16xf32, #tpu.memory_space<vmem>>, %arg7: memref<1x16x128xf32, #tpu.memory_space<vmem>>, %arg8: memref<2x1x2x128xf32, #tpu.memory_space<vmem>>, %arg9: memref<2x1x2x128xf32, #tpu.memory_space<vmem>>) attributes {dimension_semantics = [#tpu.dimension_semantics<parallel>, #tpu.dimension_semantics<parallel>], iteration_bounds = array<i64: 1, 4>, scalar_prefetch = 0 : i64, scratch_operands = 0 : i64, tpu.core_type = #tpu.core_type<tc>, window_params = [{transform_indices = @transform_0, window_bounds = array<i64: 2, 1, 2, 128>}, {transform_indices = @transform_1, window_bounds = array<i64: 2, 1, 2, 128>}, {transform_indices = @transform_2, window_bounds = array<i64: 1, 2, 16>}, {transform_indices = @transform_3, window_bounds = array<i64: 1, 16, 128>}, {transform_indices = @transform_4, window_bounds = array<i64: 1, 2, 16>}, {transform_indices = @transform_5, window_bounds = array<i64: 1, 16, 128>}, {transform_indices = @transform_6, window_bounds = array<i64: 2, 1, 2, 128>}, {transform_indices = @transform_7, window_bounds = array<i64: 2, 1, 2, 128>}]} {
    %c0 = arith.constant 0 : index
    %c0_0 = arith.constant 0 : index
    %c0_1 = arith.constant 0 : index
    %0 = vector.load %arg4[%c0, %c0_0, %c0_1] : memref<1x2x16xf32, #tpu.memory_space<vmem>>, vector<1x2x16xf32>
    %1 = vector.shape_cast %0 : vector<1x2x16xf32> to vector<2x16xf32>
    %c0_2 = arith.constant 0 : index
    %c0_3 = arith.constant 0 : index
    %c0_4 = arith.constant 0 : index
    %2 = vector.load %arg5[%c0_2, %c0_3, %c0_4] : memref<1x16x128xf32, #tpu.memory_space<vmem>>, vector<1x16x128xf32>
    %3 = vector.shape_cast %2 : vector<1x16x128xf32> to vector<16x128xf32>
    %cst = arith.constant dense<0.000000e+00> : vector<2x128xf32>
    %4 = tpu.matmul %1, %3, %cst {dimension_numbers = #tpu.dot_dimension_numbers<[1], [0], [0], [1], [0, 0, 1, 1], [], []>} : vector<2x16xf32>, vector<16x128xf32>, vector<2x128xf32> -> vector<2x128xf32>
    %c0_5 = arith.constant 0 : index
    %c0_6 = arith.constant 0 : index
    %c0_7 = arith.constant 0 : index
    %5 = vector.load %arg6[%c0_5, %c0_6, %c0_7] : memref<1x2x16xf32, #tpu.memory_space<vmem>>, vector<1x2x16xf32>
    %6 = vector.shape_cast %5 : vector<1x2x16xf32> to vector<2x16xf32>
    %c0_8 = arith.constant 0 : index
    %c0_9 = arith.constant 0 : index
    %c0_10 = arith.constant 0 : index
    %7 = vector.load %arg7[%c0_8, %c0_9, %c0_10] : memref<1x16x128xf32, #tpu.memory_space<vmem>>, vector<1x16x128xf32>
    %8 = vector.shape_cast %7 : vector<1x16x128xf32> to vector<16x128xf32>
    %cst_11 = arith.constant dense<0.000000e+00> : vector<2x128xf32>
    %9 = tpu.matmul %6, %8, %cst_11 {dimension_numbers = #tpu.dot_dimension_numbers<[1], [0], [0], [1], [0, 0, 1, 1], [], []>} : vector<2x16xf32>, vector<16x128xf32>, vector<2x128xf32> -> vector<2x128xf32>
    %c0_12 = arith.constant 0 : index
    %c0_13 = arith.constant 0 : index
    %c0_14 = arith.constant 0 : index
    %c0_15 = arith.constant 0 : index
    %10 = vector.load %arg2[%c0_12, %c0_13, %c0_14, %c0_15] : memref<2x1x2x128xf32, #tpu.memory_space<vmem>>, vector<2x1x2x128xf32>
    %11 = vector.shape_cast %10 : vector<2x1x2x128xf32> to vector<2x2x128xf32>
    %12 = vector.shape_cast %4 : vector<2x128xf32> to vector<1x2x128xf32>
    %13 = vector.broadcast %12 : vector<1x2x128xf32> to vector<2x2x128xf32>
    %14 = arith.addf %11, %13 : vector<2x2x128xf32>
    %c0_16 = arith.constant 0 : index
    %c0_17 = arith.constant 0 : index
    %c0_18 = arith.constant 0 : index
    %c0_19 = arith.constant 0 : index
    %15 = vector.load %arg8[%c0_16, %c0_17, %c0_18, %c0_19] : memref<2x1x2x128xf32, #tpu.memory_space<vmem>>, vector<2x1x2x128xf32>
    %16 = vector.shape_cast %15 : vector<2x1x2x128xf32> to vector<2x2x128xf32>
    %17 = vector.shape_cast %14 : vector<2x2x128xf32> to vector<2x1x2x128xf32>
    tpu.vector_store %arg8[%c0_16, %c0_17, %c0_18, %c0_19], %17 {strides = array<i32>} : memref<2x1x2x128xf32, #tpu.memory_space<vmem>>, vector<2x1x2x128xf32>,
    %c0_20 = arith.constant 0 : index
    %c0_21 = arith.constant 0 : index
    %c0_22 = arith.constant 0 : index
    %c0_23 = arith.constant 0 : index
    %18 = vector.load %arg3[%c0_20, %c0_21, %c0_22, %c0_23] : memref<2x1x2x128xf32, #tpu.memory_space<vmem>>, vector<2x1x2x128xf32>
    %19 = vector.shape_cast %18 : vector<2x1x2x128xf32> to vector<2x2x128xf32>
    %20 = vector.shape_cast %9 : vector<2x128xf32> to vector<1x2x128xf32>
    %21 = vector.broadcast %20 : vector<1x2x128xf32> to vector<2x2x128xf32>
    %22 = arith.addf %19, %21 : vector<2x2x128xf32>
    %c0_24 = arith.constant 0 : index
    %c0_25 = arith.constant 0 : index
    %c0_26 = arith.constant 0 : index
    %c0_27 = arith.constant 0 : index
    %23 = vector.load %arg9[%c0_24, %c0_25, %c0_26, %c0_27] : memref<2x1x2x128xf32, #tpu.memory_space<vmem>>, vector<2x1x2x128xf32>
    %24 = vector.shape_cast %23 : vector<2x1x2x128xf32> to vector<2x2x128xf32>
    %25 = vector.shape_cast %22 : vector<2x2x128xf32> to vector<2x1x2x128xf32>
    tpu.vector_store %arg9[%c0_24, %c0_25, %c0_26, %c0_27], %25 {strides = array<i32>} : memref<2x1x2x128xf32, #tpu.memory_space<vmem>>, vector<2x1x2x128xf32>,
    return
  }
  func.func @transform_0(%arg0: i32, %arg1: i32) -> (i32, i32, i32, i32) {
    %c0_i32 = arith.constant 0 : i32
    %c0_i32_0 = arith.constant 0 : i32
    %c0_i32_1 = arith.constant 0 : i32
    return %c0_i32, %arg1, %arg0, %c0_i32_0 : i32, i32, i32, i32
  }
  func.func @transform_1(%arg0: i32, %arg1: i32) -> (i32, i32, i32, i32) {
    %c0_i32 = arith.constant 0 : i32
    %c0_i32_0 = arith.constant 0 : i32
    %c0_i32_1 = arith.constant 0 : i32
    return %c0_i32, %arg1, %arg0, %c0_i32_0 : i32, i32, i32, i32
  }
  func.func @transform_2(%arg0: i32, %arg1: i32) -> (i32, i32, i32) {
    %c0_i32 = arith.constant 0 : i32
    %c0_i32_0 = arith.constant 0 : i32
    %c0_i32_1 = arith.constant 0 : i32
    return %c0_i32, %arg0, %c0_i32_0 : i32, i32, i32
  }
  func.func @transform_3(%arg0: i32, %arg1: i32) -> (i32, i32, i32) {
    %c0_i32 = arith.constant 0 : i32
    %c0_i32_0 = arith.constant 0 : i32
    %c0_i32_1 = arith.constant 0 : i32
    return %arg1, %c0_i32, %c0_i32_0 : i32, i32, i32
  }
  func.func @transform_4(%arg0: i32, %arg1: i32) -> (i32, i32, i32) {
    %c0_i32 = arith.constant 0 : i32
    %c0_i32_0 = arith.constant 0 : i32
    %c0_i32_1 = arith.constant 0 : i32
    return %c0_i32, %arg0, %c0_i32_0 : i32, i32, i32
  }
  func.func @transform_5(%arg0: i32, %arg1: i32) -> (i32, i32, i32) {
    %c0_i32 = arith.constant 0 : i32
    %c0_i32_0 = arith.constant 0 : i32
    %c0_i32_1 = arith.constant 0 : i32
    return %arg1, %c0_i32, %c0_i32_0 : i32, i32, i32
  }
  func.func @transform_6(%arg0: i32, %arg1: i32) -> (i32, i32, i32, i32) {
    %c0_i32 = arith.constant 0 : i32
    %c0_i32_0 = arith.constant 0 : i32
    %c0_i32_1 = arith.constant 0 : i32
    return %c0_i32, %arg1, %arg0, %c0_i32_0 : i32, i32, i32, i32
  }
  func.func @transform_7(%arg0: i32, %arg1: i32) -> (i32, i32, i32, i32) {
    %c0_i32 = arith.constant 0 : i32
    %c0_i32_0 = arith.constant 0 : i32
    %c0_i32_1 = arith.constant 0 : i32
    return %c0_i32, %arg1, %arg0, %c0_i32_0 : i32, i32, i32, i32
  }
}

</mosaic_0001>

<bundles_post_ra>
// kernel: tpu_custom_call.1
= control target key start
LH: loop header
LB: loop body
LE: loop exit
PB: predicated region body
PF: predicated region fallthrough
CT: control target
= control target key end

     0   :  { %s1424_s0 = inlined_call_operand.hbm [shape: f32[2,4,2,128], index: 0, kind: input, shape index: {}, may-alias: {0,6}]   ;;  %s1425_s1 = inlined_call_operand.hbm [shape: f32[2,4,2,128], index: 1, kind: input, shape index: {}, may-alias: {1,7}]   ;;  %s1426_s2 = inlined_call_operand.vmem [shape: f32[1,2,16], index: 2, kind: input, shape index: {}]   ;;  %s1427_s3 = inlined_call_operand.vmem [shape: f32[4,16,128], index: 3, kind: input, shape index: {}]   ;;  %s1428_s4 = inlined_call_operand.hbm [shape: f32[1,2,16], index: 4, kind: input, shape index: {}]   ;;  %s1429_s5 = inlined_call_operand.hbm [shape: f32[4,16,128], index: 5, kind: input, shape index: {}]   ;;  %s1430_s6 = inlined_call_operand.hbm [shape: f32[2,4,2,128], index: 6, kind: output, shape index: {0}, may-alias: {0,6}]   ;;  %s1431_s7 = inlined_call_operand.hbm [shape: f32[2,4,2,128], index: 7, kind: output, shape index: {1}, may-alias: {1,7}]  }
   0x1   :  { %1440 = sst [smem:[#allocation25_spill]] %s1424_s0 }
   0x2   :  { %1441 = sst [smem:[#allocation26_spill]] %s1426_s2 }
   0x3   :  { %1442 = sst [smem:[#allocation27_spill]] %s1427_s3 }
   0x4   :  { %1443 = sst [smem:[#allocation28_spill]] %s1428_s4 }
   0x5   :  { %1444 = sst [smem:[#allocation29_spill]] %s1430_s6 }
   0x6   :  { %1445 = sst [smem:[#allocation30_spill]] %s1431_s7 }
   0x7   :  { %13 = vsyncpa [#allocation3], 0 }
   0x8   :  { %15 = vsyncpa [#allocation3 + $0x1], 0 }
   0x9   :  { %16 = vsyncpa [#allocation6], 0 }
   0xa   :  { %18 = vsyncpa [#allocation6 + $0x1], 0 }
   0xb   :  { %19 = vsyncpa [#allocation9], 0 }
   0xc   :  { %21 = vsyncpa [#allocation9 + $0x1], 0 }
   0xd   :  { %22 = vsyncpa [#allocation4], 0 }
   0xe   :  { %24 = vsyncpa [#allocation4 + $0x1], 0 }
   0xf   :  { %25 = vsyncpa [#allocation12], 0 }
  0x10   :  { %27 = vsyncpa [#allocation12 + $0x1], 0  ;;  %s1200_s24 = smov 0   ;;  %s1202_s25 = smov 0  }
  0x11   :  { %s1204_s26 = smov 0   ;;  %s1206_s27 = smov 0  }
  0x12   :  { %s1208_s28 = smov 0   ;;  %s1210_s29 = smov 0  }
  0x13 LB: > { %1446 = sst [smem:[#allocation19_spill]] %s1130_s24  ;;  %s1231_s30 = sadd.s32 4294967295, %s1150_s29   ;;  %s1150_s29 = sphi %s1210_s29, %s33_s29   ;;  %s1146_s28 = sphi %s1208_s28, %s1474_s28   ;;  %s1142_s27 = sphi %s1206_s27, %s1473_s27   ;;  %s1138_s26 = sphi %s1204_s26, %s1469_s26   ;;  %s1134_s25 = sphi %s1202_s25, %s1472_s25   ;;  %s1130_s24 = sphi %s1200_s24, %s1471_s24  }
  0x14   : > { %1447 = sst [smem:[#allocation20_spill]] %s1138_s26  ;;  %s778_s8 = sadd.s32 4294967294, %s1150_s29  }
  0x15   : > { %p61_p0 = scmp.ne.s32.totalorder %s1138_s26, %s1134_s25  ;;  %p62_p1 = scmp.eq.s32.totalorder %s1150_s29, 0 }
  0x16   : > { %p67_p2 = scmp.ne.s32.totalorder %s1134_s25, %s1130_s24  ;;  %p68_p3 = scmp.eq.s32.totalorder %s1231_s30, 0 }
  0x17   : > { %p225_p4 = scmp.eq.s32.totalorder %s1231_s30, 3  ;;  %p1242_p5 = por %p62_p1, %p61_p0 }
  0x18   : > { %p231_p6 = scmp.eq.s32.totalorder %s778_s8, 3  ;;  %p1248_p7 = por %p68_p3, %p67_p2 }
  0x19   : > { %p1252_p8 = por %p225_p4, %p61_p0  ;;  %p779_p10 = scmp.ge.s32.totalorder %s1150_s29, 1 }
  0x1a   : > { %p1256_p9 = por %p231_p6, %p67_p2  ;;  %p266_p11 = scmp.lt.s32.totalorder %s1150_s29, 5 }
  0x1b   : > { %s1450_s12 = scalar_select %p1252_p8, 1, 0 }
  0x1c   : > { %s1452_s13 = scalar_select %p1256_p9, 1, 0 }
  0x1d   : > { %1451 = sst [smem:[#allocation21_spill]] %s1450_s12  ;;  %p1265_p12 = pnand %p779_p10, %p266_p11 }
  0x1e   : > { %1453 = sst [smem:[#allocation22_spill]] %s1452_s13  ;;  %s1152_s18 = smov [#allocation7]  }
  0x1f   : > { %s1454_s4 = sld [smem:[#allocation28_spill]]  ;;  %s289_s19 = sshll.u32 %s1152_s18, 4  ;;  %s290_s19 = int_to_ptr.vmem [resolvable:$true] %s289_s19 }
  0x20   : > { %p823_p13 = pneg %p1265_p12  ;;  %p845_p0 = scmp.lt.s32.totalorder %s1150_s29, 4 }
  0x21   : > { %s42_s21 = sadd.s32 1, %s1146_s28  ;;  %s1282_s22 = sand.u32 1, %s1138_s26  }
  0x22   : > { %p824_p1 = pnand %p823_p13, %p68_p3  ;;  %p1276_p2 = pnand %p845_p0, %p1242_p5 }
  0x23   : > { %p43_p4 = scmp.ge.s32.totalorder %s42_s21, 4  ;;  %s783_s23 = sshll.u32 %s1282_s22, 2 }
  0x24   : > { %s784_s14 = sshll.u32 %s1146_s28, 1  ;;  %s1458_s0 = sld [smem:[#allocation25_spill]] }
  0x25   : > { %s287_s16 = sshll.u32 %s1454_s4, 4  ;;  %s1476_s21 = smov (%p43_p4, %s42_s21), 0  ;;  %s288_s16 = int_to_ptr.hbm [resolvable:$true] %s287_s16 }
  0x26   : > { %826 = dma.hbm_to_vmem [thread:$0]  (!%p824_p1), %s288_s16, 32, %s290_s19, [#allocation6]  }
  0x27   : > { %1457 = sst [smem:[#allocation23_spill]] %s1476_s21  ;;  %s49_s8 = ssub.s32 %s1146_s28, %s1476_s21 }
  0x28   : > { %p52_p6 = scmp.eq.s32.totalorder %s49_s8, 0  ;;  %s304_s9 = scalar_lea.vmem [#allocation2], %s783_s23 }
  0x29   : > { %s312_s4 = sshll.u32 %s304_s9, 4  ;;  %s1459_s13 = sadd.s32 1, %s1138_s26  ;;  %s313_s4 = int_to_ptr.vmem [resolvable:$true] %s312_s4 }
  0x2a   : > { %s309_s18 = scalar_lea.hbm %s1458_s0, %s784_s14  ;;  %s301_s24 = scalar_lea.sflag [#allocation3], %s1282_s22 }
  0x2b   : > { %s1296_s16 = scalar_select %p52_p6, %s1138_s26, %s1459_s13  }
  0x2c   : > { %s310_s19 = sshll.u32 %s309_s18, 4  ;;  %s1153_s21 = smov 128   ;;  %s311_s19 = int_to_ptr.hbm [resolvable:$true] %s310_s19 }
  0x2d   : > { %1460 = sst [smem:[#allocation24_spill]] %s1296_s16  ;;  %s1154_s8 = smov 32  }
  0x2e   : > { %s1155_s12 = smov 2   ;;  %s331_s9 = scalar_lea.hbm %s1425_s1, %s784_s14 }
  0x2f   : > { %830 = dma.hbm_to_vmem [thread:$0]  (!%p1276_p2), %s311_s19, 64, %s313_s4, %s301_s24, %s1153_s21, %s1154_s8, %s1155_s12  }
  0x30   : > { %s332_s0 = sshll.u32 %s331_s9, 4  ;;  %s326_s13 = scalar_lea.vmem [#allocation5], %s783_s23  ;;  %s333_s0 = int_to_ptr.hbm [resolvable:$true] %s332_s0 }
  0x31   : > { %s334_s16 = sshll.u32 %s326_s13, 4  ;;  %s322_s18 = sand.u32 1, %s1150_s29   ;;  %s335_s16 = int_to_ptr.vmem [resolvable:$true] %s334_s16 }
  0x32   : > { %s787_s26 = sshll.u32 %s1282_s22, 4  ;;  %s323_s7 = scalar_lea.sflag [#allocation6], %s322_s18 }
  0x33   : > { %833 = dma.hbm_to_vmem [thread:$0]  (!%p1276_p2), %s333_s0, 64, %s335_s16, %s323_s7, %s1153_s21, %s1154_s8, %s1155_s12  }
  0x34   : > { %s807_s6 = sshll.u32 %s1146_s28, 4  ;;  %s356_s24 = scalar_lea.vmem [#allocation8], %s787_s26 }
  0x35   : > { %s361_s4 = scalar_lea.hbm %s1429_s5, %s807_s6  ;;  %s364_s19 = sshll.u32 %s356_s24, 4  ;;  %s365_s19 = int_to_ptr.vmem [resolvable:$true] %s364_s19 }
  0x36   : > { %s362_s14 = sshll.u32 %s361_s4, 4  ;;  %s353_s23 = scalar_lea.sflag [#allocation9], %s1282_s22  ;;  %s363_s14 = int_to_ptr.hbm [resolvable:$true] %s362_s14 }
  0x37   : > { %s1156_s10 = smov 8   ;;  %376 = sbr.rel (%p1265_p12) target bundleno = 226 (0xe2), region = 44 }
  0x38   : > { %836 = dma.hbm_to_vmem [thread:$0]  (!%p1276_p2), %s363_s14, 256, %s365_s19, %s353_s23, %s1153_s21, %s1153_s21, %s1156_s10  }
  0x39   : > { %s1318_s0 = sand.u32 (!%p1265_p12), 1, %s1134_s25  }
  0x3a   : > { %s1321_s2 = sshll.u32 (!%p1265_p12), %s1318_s0, 2  ;;  %s379_s3 = scalar_lea.sflag (!%p1265_p12), [#allocation3], %s1318_s0 }
  0x3b   : > { %s382_s6 = scalar_lea.vmem (!%p1265_p12), [#allocation2], %s1321_s2 }
  0x3c   : > { %1105 = dma.done.wait (%p1248_p7), %s379_s3, 64  }
  0x3d   : > { %1107 = vsyncadd (%p1248_p7), %s379_s3, 4294967232  ;;  %s388_s7 = sand.u32 1, %s1231_s30   ;;  %s392_s12 = scalar_lea.vmem [#allocation5], %s1321_s2 }
  0x3e   : > { %s389_s26 = scalar_lea.sflag [#allocation6], %s388_s7 }
  0x3f   : > { %1109 = dma.done.wait (%p1248_p7), %s389_s26, 64  }
  0x40   : > { %1111 = vsyncadd (%p1248_p7), %s389_s26, 4294967232 }
  0x41   : > { %1113 = dma.done.wait (%p68_p3), [#allocation6], 32  }
  0x42   : > { %1115 = vsyncadd (%p68_p3), [#allocation6], 4294967264  ;;  %s794_s17 = sshll.u32 %s1318_s0, 4  ;;  %s404_s20 = scalar_lea.sflag [#allocation9], %s1318_s0 }
  0x43   : > { %s407_s21 = scalar_lea.vmem [#allocation8], %s794_s17 }
  0x44   : > { %1117 = dma.done.wait (%p1248_p7), %s404_s20, 256  }
  0x45   : > { %1119 = vsyncadd (%p1248_p7), %s404_s20, 4294967040  ;;  %p467_p5 = scmp.lt.s32.totalorder %s1142_s27, 3  ;;  %s1461_s15 = sld [smem:[#allocation27_spill]]  ;;  %v501_v1 = vld [vmem:[%s407_s21 + $0x8] sm:$0xff]  ;;  %v500_v3 = vld [vmem:[%s407_s21] sm:$0xff]  ;;  %vm475_vm0 = vcmask 130048  }
  0x46   : > { %519 = vmatpush.msra.mxu1 %v501_v1  ;;  %s1462_s18 = sld [smem:[#allocation26_spill]]  ;;  %v499_v5 = vld [vmem:[#allocation7] sm:$0x3]  ;;  %s803_s4 = sshll.u32 %s1142_s27, 1  ;;  %v525_v6 = vld [vmem:[%s382_s6] sm:$0x3] }
  0x47   : > { %s468_s22 = scalar_select %p467_p5, %s1142_s27, 3  ;;  %v526_v7 = vld [vmem:[%s382_s6 + $0x2] sm:$0x3]  ;;  %v531_v8 = vld [vmem:[%s392_s12] sm:$0x3] }
  0x48   : > { %520 = vmatpush.msra.mxu1 %v500_v3  ;;  %s455_s24 = scalar_lea.vmem [#allocation10], %s1321_s2  ;;  %s462_s14 = scalar_lea.vmem [#allocation11], %s1321_s2  ;;  %v532_v9 = vld [vmem:[%s392_s12 + $0x2] sm:$0x3] }
  0x49   : > { %s808_s16 = sshll.u32 %s468_s22, 4  ;;  %800 = vmatmul.msk.f32.vlgmr.msra.gmra.mxu1 %vm475_vm0, %v499_v5  ;;  %s555_s19 = sshll.u32 %s455_s24, 4  ;;  %s1370_s19 = int_to_ptr.vmem [resolvable:$true] %s555_s19 }
  0x4a   : > { %s572_s23 = sshll.u32 %s462_s14, 4  ;;  %s1463_s7 = sld [smem:[#allocation29_spill]]  ;;  %s1372_s23 = int_to_ptr.vmem [resolvable:$true] %s572_s23 }
  0x4b   : > { %s471_s9 = scalar_lea.vmem %s1461_s15, %s808_s16  ;;  %s1464_s21 = sld [smem:[#allocation30_spill]] }
  0x4c   : > { %v474_v0 = vld [vmem:[%s471_s9 + $0x8] sm:$0xff]  ;;  %v473_v2 = vld [vmem:[%s471_s9] sm:$0xff]  ;;  %s538_s2 = scalar_lea.sflag [#allocation4], %s1318_s0 }
  0x4d   : > { %493 = vmatpush.msra.mxu0 %v474_v0  ;;  %v472_v4 = vld [vmem:[%s1462_s18] sm:$0x3] }
  0x4f   : > { %494 = vmatpush.msra.mxu0 %v473_v2 }
  0x50   : > { %799 = vmatmul.msk.f32.vlgmr.msra.gmra.mxu0 %vm475_vm0, %v472_v4  ;;  %s554_s26 = scalar_lea.hbm %s1463_s7, %s803_s4  ;;  %s1044_s9 = scalar_lea.hbm %s1463_s7, 16 }
  0x51   : > { %s571_s27 = scalar_lea.hbm %s1464_s21, %s803_s4  ;;  %s557_s22 = sshll.u32 %s554_s26, 4  ;;  %s558_s22 = int_to_ptr.hbm [resolvable:$true] %s557_s22 }
  0x52   : > { %s574_s6 = sshll.u32 %s571_s27, 4  ;;  %s1038_s12 = sshra.s32 %s558_s22, 4  ;;  %s1374_s6 = int_to_ptr.hbm [resolvable:$true] %s574_s6  ;;  %s1039_s12 = int_to_ptr.hbm [resolvable:$true] %s1038_s12 }
  0x53   : > { %s1040_s8 = scalar_lea.hbm %s1039_s12, 4  ;;  %p1045_p11 = scmp.lt.s32.totalorder %s1039_s12, %s1463_s7 }
  0x54   : > { %p1041_p3 = scmp.ne.s32.totalorder %s1039_s12, %s1040_s8  ;;  %p1046_p12 = scmp.lt.s32.totalorder %s1044_s9, %s1040_s8 }
  0x56   : > { %p1042_p7 = pnand %p1041_p3, %p1252_p8  ;;  %p1047_p13 = por %p1046_p12, %p1045_p11 }
  0x58   : > { %p1043_p10 = pneg %p1042_p7 }
  0x5a   : > { %p1048_p0 = pnand %p1047_p13, %p1043_p10 }
  0xc6   : > { %v522_v11 = vpop.f32.mrf.mxu1 }
  0xc7   : > { %v533_v14 = vadd.f32 %v531_v8, %v522_v11  ;;  %v534_v15 = vadd.f32 %v532_v9, %v522_v11 }
  0xc9   : > { %535 = vst [vmem:[%s462_s14] sm:$0x3] %v533_v14 }
  0xca   : > { %536 = vst [vmem:[%s462_s14 + $0x2] sm:$0x3] %v534_v15 }
  0xcd   : > { %v496_v10 = vpop.f32.mrf.mxu0 }
  0xce   : > { %v527_v12 = vadd.f32 %v525_v6, %v496_v10  ;;  %v528_v13 = vadd.f32 %v526_v7, %v496_v10 }
  0xd0   : > { %529 = vst [vmem:[%s455_s24] sm:$0x3] %v527_v12 }
  0xd1   : > { %530 = vst [vmem:[%s455_s24 + $0x2] sm:$0x3] %v528_v13 }
  0xd2   : > { %1051 = shalt.err (!%p1048_p0)
}
  0xd3   : > { %s1157_s18 = smov 32   ;;  %s1158_s4 = smov 128  }
  0xd4   : > { %s1159_s24 = smov 2   ;;  %s543_s14 = scalar_lea.sflag [#allocation12], %s1318_s0 }
  0xd5   : > { %819 = dma.vmem_to_hbm [thread:$0]  (%p1252_p8), %s1370_s19, 64, %s558_s22, %s538_s2, %s1157_s18, %s1158_s4, %s1159_s24  }
  0xd6   : > { %s1066_s10 = sshra.s32 %s1374_s6, 4  ;;  %s1072_s20 = scalar_lea.hbm %s1464_s21, 16  ;;  %s1067_s10 = int_to_ptr.hbm [resolvable:$true] %s1066_s10 }
  0xd7   : > { %s1068_s3 = scalar_lea.hbm %s1067_s10, 4  ;;  %p1073_p6 = scmp.lt.s32.totalorder %s1067_s10, %s1464_s21 }
  0xd8   : > { %p1069_p1 = scmp.ne.s32.totalorder %s1067_s10, %s1068_s3  ;;  %p1074_p5 = scmp.lt.s32.totalorder %s1072_s20, %s1068_s3 }
  0xda   : > { %p1070_p2 = pnand %p1069_p1, %p1252_p8  ;;  %p1075_p3 = por %p1074_p5, %p1073_p6 }
  0xdc   : > { %p1071_p4 = pneg %p1070_p2 }
  0xde   : > { %p1076_p7 = pnand %p1075_p3, %p1071_p4 }
  0xe0   : > { %1079 = shalt.err (!%p1076_p7)
}
  0xe1   : > { %820 = dma.vmem_to_hbm [thread:$0]  (%p1252_p8), %s1372_s23, 64, %s1374_s6, %s543_s14, %s1157_s18, %s1158_s4, %s1159_s24  }
  0xe2 PF: > { %s1466_s0 = sld [smem:[#allocation19_spill]]  ;;  %p847_p10 = scmp.ge.s32.totalorder %s1150_s29, 2 }
  0xe4   : > { %p838_p11 = pnand %p847_p10, %p1256_p9 }
  0xe6   : > { %p839_p12 = pneg %p838_p11 }
  0xe8   : > { %s589_s22 = sand.u32 1, %s1466_s0  }
  0xe9   : > { %s590_s2 = scalar_lea.sflag [#allocation4], %s589_s22 }
  0xea   : > { %1121 = dma.done.wait (%p839_p12), %s590_s2, 64  }
  0xeb   : > { %1123 = vsyncadd (%p839_p12), %s590_s2, 4294967232  ;;  %s600_s8 = scalar_lea.sflag [#allocation12], %s589_s22 }
  0xec   : > { %1125 = dma.done.wait (%p839_p12), %s600_s8, 64  }
  0xed   : > { %1127 = vsyncadd (%p839_p12), %s600_s8, 4294967232  ;;  %s33_s29 = sadd.s32 1, %s1150_s29   ;;  %s1468_s23 = sld [smem:[#allocation20_spill]] }
  0xee   : > { %p30_p13 = scmp.ge.s32.totalorder %s33_s29, 6   ;;  %s1469_s26 = sld [smem:[#allocation24_spill]] }
  0xef   : > { %s1470_s16 = sld [smem:[#allocation23_spill]]  ;;  %s1471_s24 = smov %s1134_s25 }
  0xf0   : > { %s1473_s27 = smov %s1146_s28 }
  0xf1   :  { %32 = sbr.rel (!%p30_p13) target bundleno = 19 (0x13), region = 143 }
  0xf3   : > { %s1472_s25 = smov %s1468_s23 }
  0xf5   : > { %s1474_s28 = smov %s1470_s16 }
  0xf6   :  { %606 = vsyncpa [#allocation3], 1 }
  0xf7   :  { %608 = vsyncpa [#allocation3 + $0x1], 1 }
  0xf8   :  { %609 = vsyncpa [#allocation6], 1 }
  0xf9   :  { %611 = vsyncpa [#allocation6 + $0x1], 1 }
  0xfa   :  { %612 = vsyncpa [#allocation9], 1 }
  0xfb   :  { %614 = vsyncpa [#allocation9 + $0x1], 1 }
  0xfc   :  { %615 = vsyncpa [#allocation4], 1 }
  0xfd   :  { %617 = vsyncpa [#allocation4 + $0x1], 1 }
  0xfe   :  { %618 = vsyncpa [#allocation12], 1 }
  0xff   :  { %620 = vsyncpa [#allocation12 + $0x1], 1 }

</bundles_post_ra>
